<compile_context>
chip_gen: v5e
topology: v5e:2x2
jax: 0.10.0
libtpu: 0.0.40
codegen_flags: <defaults>
</compile_context>

<pallas_src>
import jax
import jax.numpy as jnp
from jax.experimental import pallas as pl
from jax.experimental.pallas import tpu as pltpu


def linear_kernel(x_ref, wt_ref, b_ref, o_ref):
    # x_ref:  (TB, F_in)    batch tile (streamed, double-buffered)
    # wt_ref: (F_in, F_out) pre-transposed weight, resident across the grid
    # b_ref:  (1, F_out)    bias, resident across the grid
    # One MXU matmul (no in-kernel transpose) + a VPU broadcast-add for bias.
    y = jnp.dot(x_ref[...], wt_ref[...], preferred_element_type=jnp.float32)
    o_ref[...] = (y + b_ref[...]).astype(o_ref.dtype)


def _round_up(n: int, m: int) -> int:
    return ((n + m - 1) // m) * m


def _choose_batch_tile(B: int) -> int:
    """Pick a batch tile (multiple of 8).

    - Tiny batches: one tile covering the (8-padded) batch.
    - Medium batches (<= TB_MAX rows): split into two balanced tiles so v7x's
      two TensorCores both get work.
    - Large batches: stream TB_MAX-row tiles (VMEM use ~ 2 KiB/row of tile
      when lane-padded, so 4096 rows ~ 8 MiB double-buffered in+out).
    """
    TB_MAX = 4096
    pb = _round_up(max(B, 1), 8)
    if pb <= 16:
        return pb
    if pb <= TB_MAX:
        return _round_up(pl.cdiv(pb, 2), 8)
    return TB_MAX


def simple_model_forward(x, w, b):
    """y = x @ w.T + b  (torch nn.Linear semantics). x: (B, F_in), w: (F_out, F_in)."""
    B, F_in = x.shape
    F_out = w.shape[0]

    # Static pre-transpose + 2-D bias (done once by XLA, never inside the kernel).
    wt = w.T                      # (F_in, F_out)
    b2d = b.reshape(1, F_out)

    tb = _choose_batch_tile(B)
    padded_B = _round_up(B, tb)
    x_p = x if padded_B == B else jnp.pad(x, ((0, padded_B - B), (0, 0)))
    grid = (padded_B // tb,)

    itemsize = jnp.dtype(x.dtype).itemsize
    cost = pl.CostEstimate(
        flops=2 * padded_B * F_in * F_out,
        transcendentals=0,
        bytes_accessed=(padded_B * F_in + F_in * F_out + F_out + padded_B * F_out)
        * itemsize,
    )

    # Estimate lane-padded VMEM: (in + out) tiles, double-buffered, last dim
    # padded to 128 lanes.  Only raise the scoped limit when we actually need
    # more than v5e's 16 MiB default (leave headroom under v7x's 64 MiB).
    vmem_est = 4 * tb * 128 * itemsize
    vmem_limit = None
    if vmem_est > 12 * 1024 * 1024:
        vmem_limit = min(48 << 20, max(32 << 20, 2 * vmem_est))

    y = pl.pallas_call(
        linear_kernel,
        out_shape=jax.ShapeDtypeStruct((padded_B, F_out), x.dtype),
        grid=grid,
        in_specs=[
            # Batch tile streams through VMEM (double-buffered by the pipeline).
            pl.BlockSpec((tb, F_in), lambda i: (i, 0),
                         memory_space=pltpu.MemorySpace.VMEM),
            # Weight / bias map to the same block every step -> VMEM-resident.
            pl.BlockSpec((F_in, F_out), lambda i: (0, 0),
                         memory_space=pltpu.MemorySpace.VMEM),
            pl.BlockSpec((1, F_out), lambda i: (0, 0),
                         memory_space=pltpu.MemorySpace.VMEM),
        ],
        out_specs=pl.BlockSpec((tb, F_out), lambda i: (i, 0),
                               memory_space=pltpu.MemorySpace.VMEM),
        compiler_params=pltpu.CompilerParams(
            # Disjoint output tiles per batch block -> shardable across v7x's 2 TCs.
            dimension_semantics=("parallel",),
            vmem_limit_bytes=vmem_limit,
        ),
        cost_estimate=cost,
    )(x_p, wt, b2d)

    return y if padded_B == B else y[:B]
    # TODO(synk): if the surrounding graph ever supplies feature-major data,
    # switch to the transposed (W @ x^T) lane-dense formulation and/or bf16
    # activations for ~2x on the streaming path.


if __name__ == "__main__":
    key = jax.random.PRNGKey(0)
    kx, kw, kb, kx2 = jax.random.split(key, 4)

    B, F_IN, F_OUT = 8, 10, 10

    # Deterministic parameter init mimicking nn.Linear's U(-1/sqrt(F_in), 1/sqrt(F_in)).
    bound = 1.0 / jnp.sqrt(jnp.float32(F_IN))
    w = jax.random.uniform(kw, (F_OUT, F_IN), jnp.float32, -bound, bound)
    b = jax.random.uniform(kb, (F_OUT,), jnp.float32, -bound, bound)

    x = jax.random.normal(kx, (B, F_IN), jnp.float32)

    y = simple_model_forward(x, w, b)
    jax.block_until_ready(y)
    y_ref = x @ w.T + b
    assert y.shape == y_ref.shape
    assert jnp.allclose(y, y_ref, atol=1e-5, rtol=1e-5), "mismatch vs reference"

    # Also exercise the padded / non-divisible batch path.
    x2 = jax.random.normal(kx2, (5, F_IN), jnp.float32)
    y2 = simple_model_forward(x2, w, b)
    jax.block_until_ready(y2)
    y2_ref = x2 @ w.T + b
    assert y2.shape == y2_ref.shape
    assert jnp.allclose(y2, y2_ref, atol=1e-5, rtol=1e-5), "mismatch vs reference (padded path)"

    print("KERNEL_OK")
</pallas_src>

<mosaic_0001>
module attributes {stable_mosaic.version = 11 : i64} {
  func.func @linear_kernel(%arg0: i32, %arg1: memref<8x10xf32, #tpu.memory_space<vmem>>, %arg2: memref<10x10xf32, #tpu.memory_space<vmem>>, %arg3: memref<1x10xf32, #tpu.memory_space<vmem>>, %arg4: memref<8x10xf32, #tpu.memory_space<vmem>>) attributes {dimension_semantics = [#tpu.dimension_semantics<parallel>], iteration_bounds = array<i64: 1>, scalar_prefetch = 0 : i64, scratch_operands = 0 : i64, tpu.core_type = #tpu.core_type<tc>, window_params = [{transform_indices = @transform_0, window_bounds = array<i64: 8, 10>}, {pipeline_mode = #tpu.pipeline_mode<synchronous>, transform_indices = @transform_1, window_bounds = array<i64: 10, 10>}, {pipeline_mode = #tpu.pipeline_mode<synchronous>, transform_indices = @transform_2, window_bounds = array<i64: 1, 10>}, {transform_indices = @transform_3, window_bounds = array<i64: 8, 10>}]} {
    %c0 = arith.constant 0 : index
    %c0_0 = arith.constant 0 : index
    %0 = vector.load %arg1[%c0, %c0_0] : memref<8x10xf32, #tpu.memory_space<vmem>>, vector<8x10xf32>
    %c0_1 = arith.constant 0 : index
    %c0_2 = arith.constant 0 : index
    %1 = vector.load %arg2[%c0_1, %c0_2] : memref<10x10xf32, #tpu.memory_space<vmem>>, vector<10x10xf32>
    %cst = arith.constant dense<0.000000e+00> : vector<8x10xf32>
    %2 = tpu.matmul %0, %1, %cst {dimension_numbers = #tpu.dot_dimension_numbers<[1], [0], [0], [1], [0, 0, 1, 1], [], []>} : vector<8x10xf32>, vector<10x10xf32>, vector<8x10xf32> -> vector<8x10xf32>
    %c0_3 = arith.constant 0 : index
    %c0_4 = arith.constant 0 : index
    %3 = vector.load %arg3[%c0_3, %c0_4] : memref<1x10xf32, #tpu.memory_space<vmem>>, vector<1x10xf32>
    %4 = vector.broadcast %3 : vector<1x10xf32> to vector<8x10xf32>
    %5 = arith.addf %2, %4 : vector<8x10xf32>
    %c0_5 = arith.constant 0 : index
    %c0_6 = arith.constant 0 : index
    %6 = vector.load %arg4[%c0_5, %c0_6] : memref<8x10xf32, #tpu.memory_space<vmem>>, vector<8x10xf32>
    tpu.vector_store %arg4[%c0_5, %c0_6], %5 {strides = array<i32>} : memref<8x10xf32, #tpu.memory_space<vmem>>, vector<8x10xf32>,
    return
  }
  func.func @transform_0(%arg0: i32) -> (i32, i32) {
    %c0_i32 = arith.constant 0 : i32
    %c0_i32_0 = arith.constant 0 : i32
    return %arg0, %c0_i32 : i32, i32
  }
  func.func @transform_1(%arg0: i32) -> (i32, i32) {
    %c0_i32 = arith.constant 0 : i32
    %c0_i32_0 = arith.constant 0 : i32
    %c0_i32_1 = arith.constant 0 : i32
    return %c0_i32, %c0_i32_0 : i32, i32
  }
  func.func @transform_2(%arg0: i32) -> (i32, i32) {
    %c0_i32 = arith.constant 0 : i32
    %c0_i32_0 = arith.constant 0 : i32
    %c0_i32_1 = arith.constant 0 : i32
    return %c0_i32, %c0_i32_0 : i32, i32
  }
  func.func @transform_3(%arg0: i32) -> (i32, i32) {
    %c0_i32 = arith.constant 0 : i32
    %c0_i32_0 = arith.constant 0 : i32
    return %arg0, %c0_i32 : i32, i32
  }
}

</mosaic_0001>

<bundles_post_ra>
// kernel: tpu_custom_call.1
= control target key start
LH: loop header
LB: loop body
LE: loop exit
PB: predicated region body
PF: predicated region fallthrough
CT: control target
= control target key end

     0   :  { %8 = vsyncpa [#allocation3], 0  ;;  %s222_s0 = inlined_call_operand.hbm [shape: f32[8,10], index: 0, kind: input, shape index: {}]   ;;  %s223_s1 = inlined_call_operand.hbm [shape: f32[10,10], index: 1, kind: input, shape index: {}]   ;;  %s224_s2 = inlined_call_operand.vmem [shape: f32[1,10], index: 2, kind: input, shape index: {}]   ;;  %s225_s3 = inlined_call_operand.hbm [shape: f32[8,10], index: 3, kind: output, shape index: {}]  }
   0x1   :  { %9 = vsyncpa [#allocation6], 0 }
   0x2   :  { %10 = vsyncpa [#allocation4], 0  ;;  %s16_s14 = sshll.u32 %s222_s0, 4  ;;  %s185_s15 = smov [#allocation2]   ;;  %s17_s14 = int_to_ptr.hbm [resolvable:$true] %s16_s14 }
   0x3   :  { %s18_s16 = sshll.u32 %s185_s15, 4  ;;  %s26_s19 = sshll.u32 %s223_s1, 4  ;;  %s19_s16 = int_to_ptr.vmem [resolvable:$true] %s18_s16  ;;  %s27_s19 = int_to_ptr.hbm [resolvable:$true] %s26_s19 }
   0x4   :  { %21 = dma.hbm_to_vmem [thread:$0]  %s17_s14, 128, %s19_s16, [#allocation3]  }
   0x5   :  { %s186_s20 = smov [#allocation5]   ;;  %s187_s22 = smov 128  }
   0x6   :  { %s28_s21 = sshll.u32 %s186_s20, 4  ;;  %s188_s23 = smov 8   ;;  %s29_s21 = int_to_ptr.vmem [resolvable:$true] %s28_s21 }
   0x7   :  { %34 = dma.hbm_to_vmem [thread:$0]  %s27_s19, 256, %s29_s21, [#allocation6], %s187_s22, %s187_s22, %s188_s23  }
   0x8   :  { %179 = dma.done.wait [#allocation3], 128  }
   0x9   :  { %180 = vsyncadd [#allocation3], 4294967168 }
   0xa   :  { %181 = dma.done.wait [#allocation6], 256  }
   0xb   :  { %182 = vsyncadd [#allocation6], 4294967040  ;;  %vm56_vm0 = vcmask 1041408   ;;  %v47_v0 = vld [vmem:[#allocation5 + $0x8] sm:$0x3]  ;;  %v46_v1 = vld [vmem:[#allocation5] sm:$0xff] }
   0xc   :  { %99 = vmatpush.msk.msra.mxu0 %vm56_vm0, %v47_v0  ;;  %v45_v2 = vld [vmem:[#allocation2] sm:$0xff]  ;;  %vm52_vm1 = vcmask 80896   ;;  %s189_s24 = smov [#allocation7]   ;;  %s88_s28 = sshll.u32 %s225_s3, 4  ;;  %s89_s28 = int_to_ptr.hbm [resolvable:$true] %s88_s28 }
   0xd   :  { %v106_v3 = vld [vmem:[%s224_s2] ss:$0 sm:$0xff]  ;;  %s86_s25 = sshll.u32 %s189_s24, 4  ;;  %s87_s25 = int_to_ptr.vmem [resolvable:$true] %s86_s25 }
   0xe   :  { %75 = vmatpush.msra.mxu0 %v46_v1 }
   0xf   :  { %100 = vmatmul.msk.f32.vlgmr.msra.gmra.mxu0 %vm52_vm1, %v45_v2 }
  0x8c   :  { %v77_v4 = vpop.f32.mrf.mxu0 }
  0x8d   :  { %v78_v5 = vadd.f32 %v106_v3, %v77_v4 }
  0x8f   :  { %80 = vst.msk [vmem:[#allocation7] sm:$0xff] %vm52_vm1, %v78_v5 }
  0x90   :  { %91 = dma.vmem_to_hbm [thread:$0]  %s87_s25, 128, %s89_s28, [#allocation4]  }
  0x91   :  { %183 = dma.done.wait [#allocation4], 128  }
  0x92   :  { %184 = vsyncadd [#allocation4], 4294967168 }
  0x93   :  { %96 = vsyncpa [#allocation3], 1 }
  0x94   :  { %97 = vsyncpa [#allocation6], 1 }
  0x95   :  { %98 = vsyncpa [#allocation4], 1 }

</bundles_post_ra>
